<compile_context>
chip_gen: v7x
topology: tpu7x:2x2x1
jax: 0.10.0
libtpu: 0.0.40
codegen_flags: <defaults>
</compile_context>

<pallas_src>
import functools

import jax
import jax.numpy as jnp
from jax.experimental import pallas as pl
from jax.experimental.pallas import tpu as pltpu


# --------------------------------------------------------------------------- kernels

def _se_single_pass_kernel(x_ref, w1t_ref, w2t_ref, o_ref, *, inv_L):
    """One batch block: squeeze (mean over L), FC -> LeakyReLU -> FC -> sigmoid, excite."""
    # Squeeze: sum over L in f32; the cast fuses into the reduce (no f32 block copy
    # kept live across the matmuls).
    pooled = jnp.sum(x_ref[...].astype(jnp.float32), axis=-1) * inv_L            # (Bblk, C)
    hidden = jnp.dot(pooled, w1t_ref[...], preferred_element_type=jnp.float32)   # (Bblk, H)
    hidden = jnp.where(hidden > 0, hidden, 0.01 * hidden)                        # LeakyReLU(0.01)
    gate = jax.nn.sigmoid(jnp.dot(hidden, w2t_ref[...],
                                  preferred_element_type=jnp.float32))           # (Bblk, C)
    # Excite: re-read x from VMEM and multiply by the gate cast to x's dtype.
    o_ref[...] = (x_ref[...] * gate[:, :, None].astype(x_ref.dtype)).astype(o_ref.dtype)


def _se_gate_kernel(x_ref, w1t_ref, w2t_ref, g_ref, acc_ref, *, inv_L, L_actual, tL):
    """L-tiled squeeze + FC stack; emits the (1, C, 1) gate at the last L step."""
    l = pl.program_id(1)

    @pl.when(l == 0)
    def _():
        acc_ref[...] = jnp.zeros_like(acc_ref)

    xb = x_ref[...].astype(jnp.float32)                                           # (1, C, tL)
    if L_actual % tL != 0:
        # Mask the out-of-bounds tail of the (partial) last L tile.
        col = l * tL + jax.lax.broadcasted_iota(jnp.int32, xb.shape, 2)
        xb = jnp.where(col < L_actual, xb, 0.0)
    acc_ref[...] += jnp.sum(xb, axis=-1)                                          # (1, C)

    @pl.when(l == pl.num_programs(1) - 1)
    def _():
        pooled = acc_ref[...] * inv_L                                             # (1, C)
        hidden = jnp.dot(pooled, w1t_ref[...], preferred_element_type=jnp.float32)
        hidden = jnp.where(hidden > 0, hidden, 0.01 * hidden)
        gate = jax.nn.sigmoid(jnp.dot(hidden, w2t_ref[...],
                                      preferred_element_type=jnp.float32))
        g_ref[...] = gate[:, :, None]                                             # (1, C, 1)


def _se_excite_kernel(x_ref, g_ref, o_ref):
    """Lane-dense elementwise excite: out = x * gate (gate broadcast over L)."""
    o_ref[...] = (x_ref[...] * g_ref[...].astype(x_ref.dtype)).astype(o_ref.dtype)


# --------------------------------------------------------------------------- policy

def _tpu_budgets(user_target_block_bytes=None):
    """Generation-aware (target_block_bytes, vmem_limit_bytes, two_tensorcores)."""
    vmem_phys = 64 * 1024 * 1024                       # conservative default (v7x floor)
    try:
        vmem_phys = int(pltpu.get_tpu_info().vmem_capacity_bytes)
    except Exception:
        pass                                           # keep the conservative default
    # ~96 MiB limit / ~8 MiB blocks on v5e/v6e (128 MiB VMEM); ~48 MiB / ~6 MiB on v7x.
    vmem_limit = min(vmem_phys * 3 // 4, 96 * 1024 * 1024)
    target = max(512 * 1024, min(vmem_limit // 8, 8 * 1024 * 1024))
    # Only v7x pairs 2 TensorCores with 64 MiB VMEM per core.
    two_tc = 48 * 1024 * 1024 <= vmem_phys < 96 * 1024 * 1024
    if user_target_block_bytes is not None:
        target = int(user_target_block_bytes)
    return target, vmem_limit, two_tc


def _choose_bblk(B, C, L, itemsize, target_block_bytes, two_tensorcores):
    """Batch-block size: as large as the byte budget allows (no divisor-of-B needed —
    the grid uses pl.cdiv and rows are independent).  On v7x, keep >= 2 reasonably
    sized grid steps so dimension_semantics=('parallel',) can use both TensorCores."""
    per_batch = max(1, C * L * itemsize)
    bblk = max(1, min(B, target_block_bytes // per_batch))
    if two_tensorcores and B >= 2:
        min_block = 1 << 20   # below ~1 MiB, splitting only adds per-step overhead
        if bblk >= B:
            half = pl.cdiv(B, 2)
            if half * per_batch >= min_block:
                bblk = half
        steps = pl.cdiv(B, bblk)
        if steps > 1 and steps % 2 == 1:
            alt = pl.cdiv(B, steps + 1)     # prefer an even step count (core balance)
            if alt * per_batch >= min_block:
                bblk = alt
    return bblk


# --------------------------------------------------------------------------- wrappers

def _se_single_pass(x, w1_t, w2_t, target, vmem_limit, two_tc):
    B, C, L = x.shape
    H = w1_t.shape[1]
    itemsize = jnp.dtype(x.dtype).itemsize

    # Lane-dense output guard: pad L to a multiple of 128 when the waste is small so
    # stores are unmasked vst.  Zero padding cannot bias the mean (kernel divides by
    # the true L) and padded columns are sliced off afterwards.
    L_pad = L
    if L % 128 != 0:
        cand = pl.cdiv(L, 128) * 128
        if cand - L <= max(L // 8, 0) and C * cand * itemsize <= target:
            L_pad = cand
    xp = x if L_pad == L else jnp.pad(x, ((0, 0), (0, 0), (0, L_pad - L)))

    bblk = _choose_bblk(B, C, L_pad, itemsize, target, two_tc)
    grid = (pl.cdiv(B, bblk),)   # partial last block is safe: rows are independent and
                                 # Pallas discards the padded output rows.

    kernel = functools.partial(_se_single_pass_kernel, inv_L=1.0 / L)
    out = pl.pallas_call(
        kernel,
        out_shape=jax.ShapeDtypeStruct((B, C, L_pad), x.dtype),
        grid=grid,
        in_specs=[
            pl.BlockSpec((bblk, C, L_pad), lambda b: (b, 0, 0)),                    # x
            pl.BlockSpec((C, H), lambda b: (0, 0), pipeline_mode=pl.Buffered(1)),   # W1^T
            pl.BlockSpec((H, C), lambda b: (0, 0), pipeline_mode=pl.Buffered(1)),   # W2^T
        ],
        out_specs=pl.BlockSpec((bblk, C, L_pad), lambda b: (b, 0, 0)),
        compiler_params=pltpu.CompilerParams(
            dimension_semantics=("parallel",),
            vmem_limit_bytes=vmem_limit,
        ),
    )(xp, w1_t, w2_t)
    return out if L_pad == L else out[..., :L]


def _se_two_pass(x, w1_t, w2_t, target, vmem_limit):
    """Fallback for (C, L) slabs that do not fit one VMEM block: L-tiled two-pass."""
    B, C, L = x.shape
    H = w1_t.shape[1]
    itemsize = jnp.dtype(x.dtype).itemsize

    # L tile: multiple of 128, sized to roughly half the block byte budget.
    tL = max(128, ((target // 2) // max(1, C * itemsize)) // 128 * 128)
    tL = min(tL, pl.cdiv(L, 128) * 128)
    n_l = pl.cdiv(L, tL)
    # TODO(synk): if even a (1, C, 128) tile exceeds the VMEM budget (very large C),
    # tile the channel dimension of the pooling sweep as well.

    # Pass 1: pooled channel sums + FC stack -> gate (B, C, 1) in f32.
    gate_kernel = functools.partial(_se_gate_kernel, inv_L=1.0 / L, L_actual=L, tL=tL)
    gate = pl.pallas_call(
        gate_kernel,
        out_shape=jax.ShapeDtypeStruct((B, C, 1), jnp.float32),
        grid=(B, n_l),
        in_specs=[
            pl.BlockSpec((1, C, tL), lambda b, l: (b, 0, l)),
            pl.BlockSpec((C, H), lambda b, l: (0, 0), pipeline_mode=pl.Buffered(1)),
            pl.BlockSpec((H, C), lambda b, l: (0, 0), pipeline_mode=pl.Buffered(1)),
        ],
        out_specs=pl.BlockSpec((1, C, 1), lambda b, l: (b, 0, 0)),
        scratch_shapes=[pltpu.VMEM((1, C), jnp.float32)],
        compiler_params=pltpu.CompilerParams(
            dimension_semantics=("parallel", "arbitrary"),
            vmem_limit_bytes=vmem_limit,
        ),
    )(x, w1_t, w2_t)

    # Pass 2: lane-dense elementwise excite.
    return pl.pallas_call(
        _se_excite_kernel,
        out_shape=jax.ShapeDtypeStruct((B, C, L), x.dtype),
        grid=(B, n_l),
        in_specs=[
            pl.BlockSpec((1, C, tL), lambda b, l: (b, 0, l)),
            pl.BlockSpec((1, C, 1), lambda b, l: (b, 0, 0)),
        ],
        out_specs=pl.BlockSpec((1, C, tL), lambda b, l: (b, 0, l)),
        compiler_params=pltpu.CompilerParams(
            dimension_semantics=("parallel", "parallel"),
            vmem_limit_bytes=vmem_limit,
        ),
    )(x, gate)


def se_layer(x, w1, w2, *, target_block_bytes=None, io_dtype=None):
    """SELayer forward.  x: (B, C, L); w1: (H, C); w2: (C, H) with H = C // reduction
    (PyTorch Linear weight layout, bias=False).

    io_dtype: optionally cast x (and the output) to e.g. jnp.bfloat16 — the kernel is
    HBM-bandwidth bound, so halving the element size is ~2x wall-clock; FC math stays
    in f32.  Default None preserves the input dtype/numerics exactly.
    """
    B, C, L = x.shape
    H = w1.shape[0]
    assert w1.shape == (H, C) and w2.shape == (C, H), "expected PyTorch Linear layouts"

    if io_dtype is not None and x.dtype != jnp.dtype(io_dtype):
        x = x.astype(io_dtype)

    # Transpose weights once on the host side; they stay VMEM-resident inside kernels.
    w1_t = w1.T   # (C, H)
    w2_t = w2.T   # (H, C)

    target, vmem_limit, two_tc = _tpu_budgets(target_block_bytes)
    per_batch = C * L * jnp.dtype(x.dtype).itemsize

    if per_batch <= target:
        return _se_single_pass(x, w1_t, w2_t, target, vmem_limit, two_tc)
    return _se_two_pass(x, w1_t, w2_t, target, vmem_limit)


def se_layer_ref(x, w1, w2):
    """Pure-JAX reference (matches the PyTorch module numerics in f32)."""
    y = jnp.mean(x.astype(jnp.float32), axis=-1)                  # (B, C)
    h = y @ w1.T.astype(jnp.float32)                              # (B, H)
    h = jnp.where(h > 0, h, 0.01 * h)                             # LeakyReLU(0.01)
    g = jax.nn.sigmoid(h @ w2.T.astype(jnp.float32))              # (B, C)
    return (x.astype(jnp.float32) * g[:, :, None]).astype(x.dtype)


if __name__ == "__main__":
    keys = jax.random.split(jax.random.PRNGKey(0), 6)

    # --- 1) single-pass path: B=8, C=64, L=128, reduction=16 (H=4), f32 I/O.
    B, C, L, H = 8, 64, 128, 4
    x = jax.random.normal(keys[0], (B, C, L), dtype=jnp.float32)
    w1 = jax.random.normal(keys[1], (H, C), dtype=jnp.float32) * 0.1
    w2 = jax.random.normal(keys[2], (C, H), dtype=jnp.float32) * 0.1
    out = jax.block_until_ready(se_layer(x, w1, w2))
    ref = se_layer_ref(x, w1, w2)
    assert out.shape == ref.shape and out.dtype == ref.dtype
    assert jnp.allclose(out, ref, atol=1e-3, rtol=1e-3), "single-pass mismatch vs reference"

    # --- 2) L-tiled two-pass fallback (forced with a tiny block budget); L is not a
    #        multiple of 128 so the tail mask / partial-tile handling is exercised.
    B2, C2, L2, H2 = 4, 32, 300, 4
    x2 = jax.random.normal(keys[3], (B2, C2, L2), dtype=jnp.float32)
    w12 = jax.random.normal(keys[4], (H2, C2), dtype=jnp.float32) * 0.1
    w22 = jax.random.normal(keys[5], (C2, H2), dtype=jnp.float32) * 0.1
    out2 = jax.block_until_ready(se_layer(x2, w12, w22, target_block_bytes=16 * 1024))
    ref2 = se_layer_ref(x2, w12, w22)
    assert jnp.allclose(out2, ref2, atol=1e-3, rtol=1e-3), "two-pass mismatch vs reference"

    # --- 3) bf16 I/O path (the main HBM-bandwidth lever); FC math stays in f32.
    out3 = jax.block_until_ready(se_layer(x, w1, w2, io_dtype=jnp.bfloat16))
    assert out3.dtype == jnp.bfloat16
    assert jnp.allclose(out3.astype(jnp.float32), ref, atol=6e-2, rtol=6e-2), "bf16 I/O mismatch"

    print("KERNEL_OK")
</pallas_src>

<mosaic_0001>
module attributes {stable_mosaic.version = 11 : i64} {
  func.func @_se_single_pass_kernel(%arg0: i32, %arg1: memref<8x64x128xf32, #tpu.memory_space<vmem>>, %arg2: memref<64x4xf32, #tpu.memory_space<vmem>>, %arg3: memref<4x64xf32, #tpu.memory_space<vmem>>, %arg4: memref<8x64x128xf32, #tpu.memory_space<vmem>>) attributes {dimension_semantics = [#tpu.dimension_semantics<parallel>], iteration_bounds = array<i64: 1>, scalar_prefetch = 0 : i64, scratch_operands = 0 : i64, tpu.core_type = #tpu.core_type<tc>, window_params = [{transform_indices = @transform_0, window_bounds = array<i64: 8, 64, 128>}, {pipeline_mode = #tpu.pipeline_mode<synchronous>, transform_indices = @transform_1, window_bounds = array<i64: 64, 4>}, {pipeline_mode = #tpu.pipeline_mode<synchronous>, transform_indices = @transform_2, window_bounds = array<i64: 4, 64>}, {transform_indices = @transform_3, window_bounds = array<i64: 8, 64, 128>}]} {
    %c0 = arith.constant 0 : index
    %c0_0 = arith.constant 0 : index
    %c0_1 = arith.constant 0 : index
    %0 = vector.load %arg1[%c0, %c0_0, %c0_1] : memref<8x64x128xf32, #tpu.memory_space<vmem>>, vector<8x64x128xf32>
    %cst = arith.constant dense<0.000000e+00> : vector<8x64xf32>
    %1 = vector.multi_reduction <add>, %0, %cst [2] : vector<8x64x128xf32> to vector<8x64xf32>
    %cst_2 = arith.constant 7.812500e-03 : f32
    %2 = vector.broadcast %cst_2 : f32 to vector<8x64xf32>
    %3 = arith.mulf %1, %2 : vector<8x64xf32>
    %c0_3 = arith.constant 0 : index
    %c0_4 = arith.constant 0 : index
    %4 = vector.load %arg2[%c0_3, %c0_4] : memref<64x4xf32, #tpu.memory_space<vmem>>, vector<64x4xf32>
    %cst_5 = arith.constant dense<0.000000e+00> : vector<8x4xf32>
    %5 = tpu.matmul %3, %4, %cst_5 {dimension_numbers = #tpu.dot_dimension_numbers<[1], [0], [0], [1], [0, 0, 1, 1], [], []>} : vector<8x64xf32>, vector<64x4xf32>, vector<8x4xf32> -> vector<8x4xf32>
    %cst_6 = arith.constant 0.000000e+00 : f32
    %6 = vector.broadcast %cst_6 : f32 to vector<8x4xf32>
    %7 = arith.cmpf ogt, %5, %6 : vector<8x4xf32>
    %cst_7 = arith.constant 0.00999999977 : f32
    %8 = vector.broadcast %cst_7 : f32 to vector<8x4xf32>
    %9 = arith.mulf %8, %5 : vector<8x4xf32>
    %10 = arith.select %7, %5, %9 : vector<8x4xi1>, vector<8x4xf32>
    %c0_8 = arith.constant 0 : index
    %c0_9 = arith.constant 0 : index
    %11 = vector.load %arg3[%c0_8, %c0_9] : memref<4x64xf32, #tpu.memory_space<vmem>>, vector<4x64xf32>
    %cst_10 = arith.constant dense<0.000000e+00> : vector<8x64xf32>
    %12 = tpu.matmul %10, %11, %cst_10 {dimension_numbers = #tpu.dot_dimension_numbers<[1], [0], [0], [1], [0, 0, 1, 1], [], []>} : vector<8x4xf32>, vector<4x64xf32>, vector<8x64xf32> -> vector<8x64xf32>
    %13 = arith.negf %12 : vector<8x64xf32>
    %14 = math.exp %13 : vector<8x64xf32>
    %cst_11 = arith.constant 1.000000e+00 : f32
    %15 = vector.broadcast %cst_11 : f32 to vector<8x64xf32>
    %16 = arith.addf %15, %14 : vector<8x64xf32>
    %17 = arith.divf %15, %16 : vector<8x64xf32>
    %c0_12 = arith.constant 0 : index
    %c0_13 = arith.constant 0 : index
    %c0_14 = arith.constant 0 : index
    %18 = vector.load %arg1[%c0_12, %c0_13, %c0_14] : memref<8x64x128xf32, #tpu.memory_space<vmem>>, vector<8x64x128xf32>
    %19 = vector.shape_cast %17 : vector<8x64xf32> to vector<8x64x1xf32>
    %20 = vector.broadcast %19 : vector<8x64x1xf32> to vector<8x64x128xf32>
    %21 = arith.mulf %18, %20 : vector<8x64x128xf32>
    %c0_15 = arith.constant 0 : index
    %c0_16 = arith.constant 0 : index
    %c0_17 = arith.constant 0 : index
    %22 = vector.load %arg4[%c0_15, %c0_16, %c0_17] : memref<8x64x128xf32, #tpu.memory_space<vmem>>, vector<8x64x128xf32>
    tpu.vector_store %arg4[%c0_15, %c0_16, %c0_17], %21 {strides = array<i32>} : memref<8x64x128xf32, #tpu.memory_space<vmem>>, vector<8x64x128xf32>,
    return
  }
  func.func @transform_0(%arg0: i32) -> (i32, i32, i32) {
    %c0_i32 = arith.constant 0 : i32
    %c0_i32_0 = arith.constant 0 : i32
    %c0_i32_1 = arith.constant 0 : i32
    return %arg0, %c0_i32, %c0_i32_0 : i32, i32, i32
  }
  func.func @transform_1(%arg0: i32) -> (i32, i32) {
    %c0_i32 = arith.constant 0 : i32
    %c0_i32_0 = arith.constant 0 : i32
    %c0_i32_1 = arith.constant 0 : i32
    return %c0_i32, %c0_i32_0 : i32, i32
  }
  func.func @transform_2(%arg0: i32) -> (i32, i32) {
    %c0_i32 = arith.constant 0 : i32
    %c0_i32_0 = arith.constant 0 : i32
    %c0_i32_1 = arith.constant 0 : i32
    return %c0_i32, %c0_i32_0 : i32, i32
  }
  func.func @transform_3(%arg0: i32) -> (i32, i32, i32) {
    %c0_i32 = arith.constant 0 : i32
    %c0_i32_0 = arith.constant 0 : i32
    %c0_i32_1 = arith.constant 0 : i32
    return %arg0, %c0_i32, %c0_i32_0 : i32, i32, i32
  }
}

</mosaic_0001>

<bundles_post_ra>
// kernel: tpu_custom_call.1
= control target key start
LH: loop header
LB: loop body
LE: loop exit
PB: predicated region body
PF: predicated region fallthrough
CT: control target
= control target key end

     0   :  { %8 = vsyncpa [#allocation3], 0  ;;  %s1848_s0 = inlined_call_operand.hbm [shape: f32[8,64,128], index: 0, kind: input, shape index: {}]   ;;  %s1849_s1 = inlined_call_operand.vmem [shape: f32[64,4], index: 1, kind: input, shape index: {}]   ;;  %s1850_s2 = inlined_call_operand.vmem [shape: f32[4,64], index: 2, kind: input, shape index: {}]   ;;  %s1851_s3 = inlined_call_operand.hbm [shape: f32[8,64,128], index: 3, kind: output, shape index: {}]  }
   0x1   :  { %9 = vsyncpa [#allocation4], 0  ;;  %s1457_s12 = smov [#allocation2]   ;;  %s1409_s16 = scalar_lea.hbm %s1848_s0, 8192 }
   0x2   :  { %s15_s13 = sshll.u32 %s1457_s12, 4  ;;  %p1410_p0 = scmp.ne.s32.totalorder %s1848_s0, %s1409_s16  ;;  %s16_s13 = int_to_ptr.vmem [resolvable:$true] %s15_s13 }
   0x3   :  { %p1413_p1 = scmp.lt.u32.totalorder %s1409_s16, %s1848_s0 }
   0x5   :  { %p1415_p2 = pnand %p1413_p1, %p1410_p0 }
   0x7   :  { %1418 = shalt.err (!%p1415_p2)
}
   0x8   :  { %s1419_s21 = scalar_lea.vmem %s16_s13, 8192  ;;  %p1424_p4 = scmp.lt.s32.totalorder %s16_s13, %s16_s13 }
   0x9   :  { %p1420_p3 = scmp.ne.s32.totalorder %s16_s13, %s1419_s21  ;;  %p1425_p5 = scmp.lt.s32.totalorder %s1419_s21, %s1419_s21 }
   0xb   :  { %p1426_p6 = por %p1425_p5, %p1424_p4 }
   0xd   :  { %p1427_p7 = pnand %p1426_p6, %p1420_p3 }
   0xf   :  { %1430 = shalt.err (!%p1427_p7)
}
  0x10   :  { %s1458_s22 = smov 128   ;;  %s1459_s23 = smov 8  }
  0x11   :  { %21 = dma.hbm_to_vmem [thread:$0]  %s1848_s0, 8192, %s16_s13, [#allocation3], %s1458_s22, %s1458_s22, %s1459_s23  }
  0x12   :  { %1453 = dma.done.wait [#allocation3], 8192  }
  0x13   :  { %1454 = vsyncadd [#allocation3], 4294959104  ;;  %v37_v0 = vld [vmem:[#allocation2 + $0x40] sm:$0xff]  ;;  %v38_v2 = vld [vmem:[#allocation2 + $0x48] sm:$0xff]  ;;  %vm1461_vm0 = vmmov 0   ;;  %vm368_vm1 = vcmask 130112  }
  0x14   :  { %v29_v1 = vld [vmem:[#allocation2] sm:$0xff]  ;;  %109 = vadd.xlane.f32.xlu1 %v37_v0  ;;  %v30_v3 = vld [vmem:[#allocation2 + $0x8] sm:$0xff]  ;;  %v39_v4 = vld [vmem:[#allocation2 + $0x50] sm:$0xff]  ;;  %vm375_vm2 = vcmask 195712   ;;  %vm382_vm3 = vcmask 261312   ;;  %vm389_vm4 = vcmask 326912  }
  0x15   :  { %93 = vadd.xlane.f32.xlu0 %v29_v1  ;;  %v31_v5 = vld [vmem:[#allocation2 + $0x10] sm:$0xff]  ;;  %v46_v6 = vld [vmem:[#allocation2 + $0x88] sm:$0xff]  ;;  %v45_v7 = vld [vmem:[#allocation2 + $0x80] sm:$0xff]  ;;  %vm396_vm5 = vcmask 392512   ;;  %vm403_vm6 = vcmask 458112   ;;  %vm410_vm7 = vcmask 523712  }
  0x16   :  { %v40_v8 = vld [vmem:[#allocation2 + $0x58] sm:$0xff]  ;;  %v53_v10 = vld [vmem:[#allocation2 + $0xc0] sm:$0xff]  ;;  %v47_v11 = vld [vmem:[#allocation2 + $0x90] sm:$0xff]  ;;  %vm685_vm8 = vcmask 1041409   ;;  %vm687_vm9 = vcmask 1042434   ;;  %vm689_vm10 = vcmask 1043459  }
  0x17   :  { %v32_v9 = vld [vmem:[#allocation2 + $0x18] sm:$0xff]  ;;  %v33_v12 = vld [vmem:[#allocation2 + $0x20] sm:$0xff]  ;;  %v54_v13 = vld [vmem:[#allocation2 + $0xc8] sm:$0xff]  ;;  %vm691_vm11 = vcmask 1044484   ;;  %vm693_vm12 = vcmask 1045509   ;;  %vm695_vm13 = vcmask 1046534  }
  0x18   :  { %111 = vadd.xlane.f32.xlu1 %v38_v2  ;;  %v48_v14 = vld [vmem:[#allocation2 + $0x98] sm:$0xff]  ;;  %v41_v15 = vld [vmem:[#allocation2 + $0x60] sm:$0xff]  ;;  %v55_v17 = vld [vmem:[#allocation2 + $0xd0] sm:$0xff]  ;;  %vm697_vm14 = vcmask 1047559   ;;  %vm699_vm15 = vcmask 523264  }
  0x19   :  { %95 = vadd.xlane.f32.xlu0 %v30_v3  ;;  %v61_v16 = vld [vmem:[#allocation2 + $0x100] sm:$0xff]  ;;  %v34_v18 = vld [vmem:[#allocation2 + $0x28] sm:$0xff]  ;;  %v63_v22 = vld [vmem:[#allocation2 + $0x110] sm:$0xff]  ;;  %v1460_v3 = vmov 0.0|0.0  }
  0x1a   :  { %v62_v19 = vld [vmem:[#allocation2 + $0x108] sm:$0xff]  ;;  %v49_v20 = vld [vmem:[#allocation2 + $0xa0] sm:$0xff]  ;;  %v56_v23 = vld [vmem:[#allocation2 + $0xd8] sm:$0xff]  ;;  %1324 = vmatprep.subr.bf16.mxu0 %v1460_v3 }
  0x1b   :  { %v42_v21 = vld [vmem:[#allocation2 + $0x68] sm:$0xff]  ;;  %v69_v25 = vld [vmem:[#allocation2 + $0x140] sm:$0xff]  ;;  %v43_v26 = vld [vmem:[#allocation2 + $0x70] sm:$0xff] }
  0x1c   :  { %113 = vadd.xlane.f32.xlu1 %v39_v4  ;;  %v70_v24 = vld [vmem:[#allocation2 + $0x148] sm:$0xff]  ;;  %v1499_v27 = vld [vmem:[#allocation2 + $0x30] sm:$0xff]  ;;  %v57_v28 = vld [vmem:[#allocation2 + $0xe0] sm:$0xff] }
  0x1d   :  { %97 = vadd.xlane.f32.xlu0 %v31_v5  ;;  %v50_v29 = vld [vmem:[#allocation2 + $0xa8] sm:$0xff]  ;;  %v71_v30 = vld [vmem:[#allocation2 + $0x150] sm:$0xff]  ;;  %v64_v31 = vld [vmem:[#allocation2 + $0x118] sm:$0xff] }
  0x1e   :  { %v78_v32 = vld [vmem:[#allocation2 + $0x188] sm:$0xff]  ;;  %v77_v33 = vld [vmem:[#allocation2 + $0x180] sm:$0xff]  ;;  %v44_v34 = vld [vmem:[#allocation2 + $0x78] sm:$0xff] }
  0x1f   :  { %v1502_v35 = vld [vmem:[#allocation2 + $0x38] sm:$0xff]  ;;  %v58_v36 = vld [vmem:[#allocation2 + $0xe8] sm:$0xff]  ;;  %v51_v37 = vld [vmem:[#allocation2 + $0xb0] sm:$0xff] }
  0x20   :  { %127 = vadd.xlane.f32.xlu1 %v46_v6  ;;  %1853 = vst [vmem:[#allocation8_spill] sm:$0xff] %v1502_v35  ;;  %v72_v38 = vld [vmem:[#allocation2 + $0x158] sm:$0xff]  ;;  %v65_v39 = vld [vmem:[#allocation2 + $0x120] sm:$0xff]  ;;  %v79_v41 = vld [vmem:[#allocation2 + $0x190] sm:$0xff] }
  0x21   :  { %125 = vadd.xlane.f32.xlu0 %v45_v7  ;;  %v85_v40 = vld [vmem:[#allocation2 + $0x1c0] sm:$0xff]  ;;  %v52_v42 = vld [vmem:[#allocation2 + $0xb8] sm:$0xff]  ;;  %v86_v43 = vld [vmem:[#allocation2 + $0x1c8] sm:$0xff] }
  0x22   :  { %v66_v44 = vld [vmem:[#allocation2 + $0x128] sm:$0xff]  ;;  %v59_v45 = vld [vmem:[#allocation2 + $0xf0] sm:$0xff]  ;;  %v80_v46 = vld [vmem:[#allocation2 + $0x198] sm:$0xff] }
  0x23   :  { %v73_v47 = vld [vmem:[#allocation2 + $0x160] sm:$0xff]  ;;  %v60_v48 = vld [vmem:[#allocation2 + $0xf8] sm:$0xff]  ;;  %v87_v49 = vld [vmem:[#allocation2 + $0x1d0] sm:$0xff] }
  0x24   :  { %115 = vadd.xlane.f32.xlu1 %v40_v8  ;;  %v74_v50 = vld [vmem:[#allocation2 + $0x168] sm:$0xff]  ;;  %v67_v51 = vld [vmem:[#allocation2 + $0x130] sm:$0xff]  ;;  %v88_v52 = vld [vmem:[#allocation2 + $0x1d8] sm:$0xff] }
  0x25   :  { %99 = vadd.xlane.f32.xlu0 %v32_v9  ;;  %v81_v53 = vld [vmem:[#allocation2 + $0x1a0] sm:$0xff]  ;;  %v75_v54 = vld [vmem:[#allocation2 + $0x170] sm:$0xff]  ;;  %v68_v55 = vld [vmem:[#allocation2 + $0x138] sm:$0xff] }
  0x26   :  { %v89_v56 = vld [vmem:[#allocation2 + $0x1e0] sm:$0xff]  ;;  %v82_v57 = vld [vmem:[#allocation2 + $0x1a8] sm:$0xff]  ;;  %v83_v58 = vld [vmem:[#allocation2 + $0x1b0] sm:$0xff] }
  0x27   :  { %v76_v59 = vld [vmem:[#allocation2 + $0x178] sm:$0xff]  ;;  %v90_v61 = vld [vmem:[#allocation2 + $0x1e8] sm:$0xff]  ;;  %v91_v62 = vld [vmem:[#allocation2 + $0x1f0] sm:$0xff] }
  0x28   :  { %141 = vadd.xlane.f32.xlu1 %v53_v10  ;;  %v84_v60 = vld [vmem:[#allocation2 + $0x1b8] sm:$0xff]  ;;  %v285_v0 = vld [vmem:[%s1849_s1] sm:$0xff]  ;;  %v286_v1 = vld [vmem:[%s1849_s1 + $0x8] sm:$0xff] }
  0x29   :  { %129 = vadd.xlane.f32.xlu0 %v47_v11  ;;  %v92_v63 = vld [vmem:[#allocation2 + $0x1f8] sm:$0xff]  ;;  %v1325_v2 = vpack.c.bf16 %v286_v1, %v285_v0  ;;  %v287_v4 = vld [vmem:[%s1849_s1 + $0x10] sm:$0xff]  ;;  %v289_v7 = vld [vmem:[%s1849_s1 + $0x20] sm:$0xff] }
  0x2a   :  { %v288_v5 = vld [vmem:[%s1849_s1 + $0x18] sm:$0xff]  ;;  %v290_v8 = vld [vmem:[%s1849_s1 + $0x28] sm:$0xff]  ;;  %v291_v10 = vld [vmem:[%s1849_s1 + $0x30] sm:$0xff] }
  0x2b   :  { %1326 = vmatpush3.bf16.msra.mxu0 %v1325_v2  ;;  %v1328_v6 = vpack.c.bf16 %v288_v5, %v287_v4  ;;  %v1331_v9 = vpack.c.bf16 %v290_v8, %v289_v7  ;;  %v292_v11 = vld [vmem:[%s1849_s1 + $0x38] sm:$0xff] }
  0x2c   :  { %101 = vadd.xlane.f32.xlu1 %v33_v12  ;;  %1327 = vmatprep.subr.bf16.mxu0 %v1460_v3  ;;  %v1334_v12 = vpack.c.bf16 %v292_v11, %v291_v10 }
  0x2d   :  { %143 = vadd.xlane.f32.xlu0 %v54_v13 }
  0x2f   :  { %1329 = vmatpush3.bf16.msra.mxu0 %v1328_v6 }
  0x30   :  { %131 = vadd.xlane.f32.xlu1 %v48_v14  ;;  %1330 = vmatprep.subr.bf16.mxu0 %v1460_v3 }
  0x31   :  { %117 = vadd.xlane.f32.xlu0 %v41_v15  ;;  %v1462_v15 = vmov 0.0  }
  0x32   :  { %1316 = vmatprep.mubr.msk.f32.mxu0 %vm1461_vm0, %v1462_v15  ;;  %1319 = vmatprep.subr.mxu1 %v1462_v15 }
  0x33   :  { %1332 = vmatpush3.bf16.msra.mxu0 %v1331_v9  ;;  %1321 = vmatprep.mubr.msk.f32.mxu1 %vm1461_vm0, %v1462_v15  ;;  %vm780_vm0 = vcmask 1043456  }
  0x34   :  { %157 = vadd.xlane.f32.xlu1 %v61_v16  ;;  %1333 = vmatprep.subr.bf16.mxu0 %v1460_v3 }
  0x35   :  { %145 = vadd.xlane.f32.xlu0 %v55_v17 }
  0x37   :  { %1335 = vmatpush3.bf16.msra.mxu0 %v1334_v12 }
  0x38   :  { %103 = vadd.xlane.f32.xlu1 %v34_v18 }
  0x39   :  { %159 = vadd.xlane.f32.xlu0 %v62_v19 }
  0x3c   :  { %133 = vadd.xlane.f32.xlu1 %v49_v20 }
  0x3d   :  { %119 = vadd.xlane.f32.xlu0 %v42_v21 }
  0x40   :  { %161 = vadd.xlane.f32.xlu1 %v63_v22 }
  0x41   :  { %147 = vadd.xlane.f32.xlu0 %v56_v23 }
  0x44   :  { %175 = vadd.xlane.f32.xlu1 %v70_v24 }
  0x45   :  { %173 = vadd.xlane.f32.xlu0 %v69_v25 }
  0x48   :  { %121 = vadd.xlane.f32.xlu1 %v43_v26 }
  0x49   :  { %105 = vadd.xlane.f32.xlu0 %v1499_v27 }
  0x4c   :  { %149 = vadd.xlane.f32.xlu1 %v57_v28 }
  0x4d   :  { %135 = vadd.xlane.f32.xlu0 %v50_v29 }
  0x50   :  { %177 = vadd.xlane.f32.xlu1 %v71_v30 }
  0x51   :  { %163 = vadd.xlane.f32.xlu0 %v64_v31 }
  0x54   :  { %191 = vadd.xlane.f32.xlu1 %v78_v32 }
  0x55   :  { %189 = vadd.xlane.f32.xlu0 %v77_v33 }
  0x58   :  { %123 = vadd.xlane.f32.xlu1 %v44_v34 }
  0x59   :  { %107 = vadd.xlane.f32.xlu0 %v1502_v35 }
  0x5c   :  { %151 = vadd.xlane.f32.xlu1 %v58_v36 }
  0x5d   :  { %137 = vadd.xlane.f32.xlu0 %v51_v37 }
  0x60   :  { %179 = vadd.xlane.f32.xlu1 %v72_v38 }
  0x61   :  { %165 = vadd.xlane.f32.xlu0 %v65_v39 }
  0x64   :  { %205 = vadd.xlane.f32.xlu1 %v85_v40 }
  0x65   :  { %193 = vadd.xlane.f32.xlu0 %v79_v41 }
  0x68   :  { %139 = vadd.xlane.f32.xlu1 %v52_v42 }
  0x69   :  { %207 = vadd.xlane.f32.xlu0 %v86_v43 }
  0x6c   :  { %167 = vadd.xlane.f32.xlu1 %v66_v44 }
  0x6d   :  { %153 = vadd.xlane.f32.xlu0 %v59_v45 }
  0x70   :  { %195 = vadd.xlane.f32.xlu1 %v80_v46 }
  0x71   :  { %181 = vadd.xlane.f32.xlu0 %v73_v47 }
  0x74   :  { %155 = vadd.xlane.f32.xlu1 %v60_v48 }
  0x75   :  { %209 = vadd.xlane.f32.xlu0 %v87_v49 }
  0x78   :  { %183 = vadd.xlane.f32.xlu1 %v74_v50  ;;  %v357_v50 = vlaneseq }
  0x79   :  { %169 = vadd.xlane.f32.xlu0 %v67_v51 }
  0x7c   :  { %211 = vadd.xlane.f32.xlu1 %v88_v52 }
  0x7d   :  { %197 = vadd.xlane.f32.xlu0 %v81_v53  ;;  %v358_v53 = vand.u32 127, %v357_v50 }
  0x80   :  { %185 = vadd.xlane.f32.xlu1 %v75_v54 }
  0x81   :  { %171 = vadd.xlane.f32.xlu0 %v68_v55 }
  0x84   :  { %213 = vadd.xlane.f32.xlu1 %v89_v56  ;;  %v1585_v56 = vshrl.u32 %v357_v50, 7  ;;  %v391_v50 = vadd.s32 4294967256, %v358_v53 }
  0x85   :  { %199 = vadd.xlane.f32.xlu0 %v82_v57  ;;  %v363_v57 = vadd.s32 4294967288, %v358_v53 }
  0x87   :  { %v1595_v0 = vsub.s32 %v363_v57, %v1585_v56  ;;  %v405_v57 = vadd.s32 4294967240, %v358_v53 }
  0x88   :  { %201 = vadd.xlane.f32.xlu1 %v83_v58  ;;  %v370_v58 = vadd.s32 4294967280, %v358_v53 }
  0x89   :  { %187 = vadd.xlane.f32.xlu0 %v76_v59  ;;  %v377_v59 = vadd.s32 4294967272, %v358_v53 }
  0x8a   :  { %v1598_v3 = vsub.s32 %v370_v58, %v1585_v56 }
  0x8b   :  { %v1601_v7 = vsub.s32 %v377_v59, %v1585_v56 }
  0x8c   :  { %203 = vadd.xlane.f32.xlu1 %v84_v60 }
  0x8d   :  { %215 = vadd.xlane.f32.xlu0 %v90_v61 }
  0x90   :  { %219 = vadd.xlane.f32.xlu1 %v92_v63  ;;  %v1592_v63 = vsub.s32 %v358_v53, %v1585_v56 }
  0x91   :  { %217 = vadd.xlane.f32.xlu0 %v91_v62  ;;  %v384_v62 = vadd.s32 4294967264, %v358_v53 }
  0x93   :  { %v1608_v12 = vsub.s32 %v384_v62, %v1585_v56 }
  0xa1   :  { %v110_v13 = vpop.xlane.xlu1 %109 }
  0xa2   :  { %v94_v14 = vpop.xlane.xlu0 %93  ;;  %v229_v1 = vmul.f32 0.0078125, %v110_v13 }
  0xa3   :  { %v221_v2 = vmul.f32 0.0078125, %v94_v14 }
  0xa5   :  { %v112_v16 = vpop.xlane.xlu1 %111 }
  0xa6   :  { %v96_v17 = vpop.xlane.xlu0 %95  ;;  %v230_v4 = vmul.f32 0.0078125, %v112_v16  ;;  %v415_v16 = vrot.slane %v229_v1, %v1592_v63 }
  0xa7   :  { %v222_v5 = vmul.f32 0.0078125, %v96_v17  ;;  %v362_v17 = vrot.slane %v221_v2, %v1592_v63 }
  0xa8   :  { %v419_v58 = vrot.slane %v230_v4, %v1595_v0 }
  0xa9   :  { %v114_v18 = vpop.xlane.xlu1 %113  ;;  %v367_v59 = vrot.slane %v222_v5, %v1595_v0 }
  0xaa   :  { %v98_v19 = vpop.xlane.xlu0 %97  ;;  %v231_v6 = vmul.f32 0.0078125, %v114_v18  ;;  %v398_v18 = vadd.s32 4294967248, %v358_v53 }
  0xab   :  { %v223_v10 = vmul.f32 0.0078125, %v98_v19 }
  0xac   :  { %v424_v19 = vrot.slane %v231_v6, %v1598_v3  ;;  %v1629_v6 = vsub.s32 %v391_v50, %v1585_v56 }
  0xad   :  { %v128_v20 = vpop.xlane.xlu1 %127 }
  0xae   :  { %v126_v21 = vpop.xlane.xlu0 %125  ;;  %v238_v11 = vmul.f32 0.0078125, %v128_v20 }
  0xaf   :  { %v237_v13 = vmul.f32 0.0078125, %v126_v21 }
  0xb1   :  { %v116_v22 = vpop.xlane.xlu1 %115  ;;  %v454_v2 = vrot.slane %v237_v13, %v1592_v63 }
  0xb2   :  { %v100_v23 = vpop.xlane.xlu0 %99  ;;  %v232_v14 = vmul.f32 0.0078125, %v116_v22  ;;  %v374_v22 = vrot.slane %v223_v10, %v1598_v3  ;;  %v1632_v10 = vsub.s32 %v398_v18, %v1585_v56 }
  0xb3   :  { %v224_v15 = vmul.f32 0.0078125, %v100_v23  ;;  %v458_v23 = vrot.slane %v238_v11, %v1595_v0  ;;  %v1635_v11 = vsub.s32 %v405_v57, %v1585_v56 }
  0xb4   :  { %v429_v4 = vrot.slane %v232_v14, %v1601_v7 }
  0xb5   :  { %v1529_v24 = vpop.xlane.xlu1 %141  ;;  %v381_v5 = vrot.slane %v224_v15, %v1601_v7 }
  0xb6   :  { %v1531_v25 = vpop.xlane.xlu0 %129 }
  0xb7   :  { %v239_v20 = vmul.f32 0.0078125, %v1531_v25  ;;  %v245_v25 = vmul.f32 0.0078125, %v1529_v24 }
  0xb9   :  { %v1533_v26 = vpop.xlane.xlu1 %101  ;;  %v463_v13 = vrot.slane %v239_v20, %v1598_v3 }
  0xba   :  { %v1535_v28 = vpop.xlane.xlu0 %143  ;;  %v225_v1 = vmul.f32 0.0078125, %v1533_v26  ;;  %v420_v26 = vsel %vm368_vm1, %v419_v58, %v415_v16  ;;  %v459_v16 = vsel %vm368_vm1, %v458_v23, %v454_v2 }
  0xbb   :  { %v246_v53 = vmul.f32 0.0078125, %v1535_v28  ;;  %v369_v28 = vsel %vm368_vm1, %v367_v59, %v362_v17  ;;  %v425_v50 = vsel %vm375_vm2, %v424_v19, %v420_v26 }
  0xbc   :  { %v376_v18 = vsel %vm375_vm2, %v374_v22, %v369_v28  ;;  %v388_v57 = vrot.slane %v225_v1, %v1608_v12  ;;  %v430_v17 = vsel %vm382_vm3, %v429_v4, %v425_v50  ;;  %v464_v1 = vsel %vm375_vm2, %v463_v13, %v459_v16 }
  0xbd   :  { %v1537_v29 = vpop.xlane.xlu1 %131  ;;  %v497_v35 = vrot.slane %v246_v53, %v1595_v0  ;;  %v383_v58 = vsel %vm382_vm3, %v381_v5, %v376_v18 }
  0xbe   :  { %v1539_v30 = vpop.xlane.xlu0 %117  ;;  %v240_v14 = vmul.f32 0.0078125, %v1537_v29  ;;  %v493_v29 = vrot.slane %v245_v25, %v1592_v63 }
  0xbf   :  { %v233_v59 = vmul.f32 0.0078125, %v1539_v30  ;;  %v390_v30 = vsel %vm389_vm4, %v388_v57, %v383_v58 }
  0xc0   :  { %v468_v53 = vrot.slane %v240_v14, %v1601_v7 }
  0xc1   :  { %v1541_v31 = vpop.xlane.xlu1 %157  ;;  %v434_v28 = vrot.slane %v233_v59, %v1608_v12 }
  0xc2   :  { %v1543_v32 = vpop.xlane.xlu0 %145  ;;  %v253_v23 = vmul.f32 0.0078125, %v1541_v31 }
  0xc3   :  { %v247_v20 = vmul.f32 0.0078125, %v1543_v32  ;;  %v498_v32 = vsel %vm368_vm1, %v497_v35, %v493_v29 }
  0xc5   :  { %v1545_v33 = vpop.xlane.xlu1 %103  ;;  %v502_v13 = vrot.slane %v247_v20, %v1598_v3  ;;  %v435_v20 = vsel %vm389_vm4, %v434_v28, %v430_v17 }
  0xc6   :  { %v1547_v34 = vpop.xlane.xlu0 %159  ;;  %v226_v19 = vmul.f32 0.0078125, %v1545_v33 }
  0xc7   :  { %v254_v22 = vmul.f32 0.0078125, %v1547_v34 }
  0xc8   :  { %v395_v14 = vrot.slane %v226_v19, %v1629_v6  ;;  %v503_v19 = vsel %vm375_vm2, %v502_v13, %v498_v32 }
  0xc9   :  { %v1549_v36 = vpop.xlane.xlu1 %133  ;;  %v536_v35 = vrot.slane %v254_v22, %v1595_v0 }
  0xca   :  { %v1551_v37 = vpop.xlane.xlu0 %119  ;;  %v241_v2 = vmul.f32 0.0078125, %v1549_v36  ;;  %v397_v22 = vsel %vm396_vm5, %v395_v14, %v390_v30 }
  0xcb   :  { %v234_v33 = vmul.f32 0.0078125, %v1551_v37  ;;  %v469_v37 = vsel %vm382_vm3, %v468_v53, %v464_v1 }
  0xcd   :  { %v1553_v38 = vpop.xlane.xlu1 %161 }
  0xce   :  { %v1555_v39 = vpop.xlane.xlu0 %147  ;;  %v255_v34 = vmul.f32 0.0078125, %v1553_v38  ;;  %v532_v38 = vrot.slane %v253_v23, %v1592_v63 }
  0xcf   :  { %v248_v25 = vmul.f32 0.0078125, %v1555_v39  ;;  %v473_v39 = vrot.slane %v241_v2, %v1608_v12 }
  0xd0   :  { %v541_v18 = vrot.slane %v255_v34, %v1598_v3  ;;  %v537_v1 = vsel %vm368_vm1, %v536_v35, %v532_v38 }
  0xd1   :  { %v1557_v40 = vpop.xlane.xlu1 %175  ;;  %v507_v58 = vrot.slane %v248_v25, %v1601_v7 }
  0xd2   :  { %v1559_v41 = vpop.xlane.xlu0 %173  ;;  %v262_v26 = vmul.f32 0.0078125, %v1557_v40  ;;  %v542_v32 = vsel %vm375_vm2, %v541_v18, %v537_v1 }
  0xd3   :  { %v261_v31 = vmul.f32 0.0078125, %v1559_v41  ;;  %v508_v25 = vsel %vm382_vm3, %v507_v58, %v503_v19 }
  0xd4   :  { %v575_v29 = vrot.slane %v262_v26, %v1595_v0 }
  0xd5   :  { %v1561_v42 = vpop.xlane.xlu1 %121  ;;  %v571_v59 = vrot.slane %v261_v31, %v1592_v63 }
  0xd6   :  { %v1563_v43 = vpop.xlane.xlu0 %105  ;;  %v235_v36 = vmul.f32 0.0078125, %v1561_v42  ;;  %v439_v42 = vrot.slane %v234_v33, %v1629_v6 }
  0xd7   :  { %v227_v40 = vmul.f32 0.0078125, %v1563_v43  ;;  %v576_v26 = vsel %vm368_vm1, %v575_v29, %v571_v59 }
  0xd8   :  { %v444_v43 = vrot.slane %v235_v36, %v1632_v10  ;;  %v440_v17 = vsel %vm396_vm5, %v439_v42, %v435_v20 }
  0xd9   :  { %v1565_v44 = vpop.xlane.xlu1 %149 }
  0xda   :  { %v1567_v45 = vpop.xlane.xlu0 %135  ;;  %v249_v57 = vmul.f32 0.0078125, %v1565_v44  ;;  %v474_v44 = vsel %vm389_vm4, %v473_v39, %v469_v37 }
  0xdb   :  { %v242_v16 = vmul.f32 0.0078125, %v1567_v45  ;;  %v402_v45 = vrot.slane %v227_v40, %v1632_v10 }
  0xdc   :  { %v512_v30 = vrot.slane %v249_v57, %v1608_v12 }
  0xdd   :  { %v1569_v46 = vpop.xlane.xlu1 %177  ;;  %v478_v34 = vrot.slane %v242_v16, %v1629_v6  ;;  %v404_v14 = vsel %vm403_vm6, %v402_v45, %v397_v22 }
  0xde   :  { %v1571_v47 = vpop.xlane.xlu0 %163 }
  0xdf   :  { %v256_v31 = vmul.f32 0.0078125, %v1571_v47  ;;  %v513_v47 = vsel %vm389_vm4, %v512_v30, %v508_v25 }
  0xe1   :  { %v1573_v48 = vpop.xlane.xlu1 %191 }
  0xe2   :  { %v1575_v49 = vpop.xlane.xlu0 %189  ;;  %v270_v36 = vmul.f32 0.0078125, %v1573_v48  ;;  %v479_v48 = vsel %vm396_vm5, %v478_v34, %v474_v44 }
  0xe3   :  { %v269_v28 = vmul.f32 0.0078125, %v1575_v49 }
  0xe4   :  { %v614_v16 = vrot.slane %v270_v36, %v1595_v0 }
  0xe5   :  { %v1577_v51 = vpop.xlane.xlu1 %123  ;;  %v610_v58 = vrot.slane %v269_v28, %v1592_v63 }
  0xe6   :  { %v1579_v52 = vpop.xlane.xlu0 %107  ;;  %v236_v53 = vmul.f32 0.0078125, %v1577_v51  ;;  %v445_v51 = vsel %vm403_vm6, %v444_v43, %v440_v17 }
  0xe7   :  { %v228_v23 = vmul.f32 0.0078125, %v1579_v52  ;;  %v263_v52 = vmul.f32 0.0078125, %v1569_v46 }
  0xe8   :  { %v449_v35 = vrot.slane %v236_v53, %v1635_v11 }
  0xe9   :  { %v1581_v54 = vpop.xlane.xlu1 %151  ;;  %v409_v37 = vrot.slane %v228_v23, %v1635_v11  ;;  %v580_v40 = vrot.slane %v263_v52, %v1598_v3  ;;  %v615_v23 = vsel %vm368_vm1, %v614_v16, %v610_v58 }
  0xea   :  { %v1583_v55 = vpop.xlane.xlu0 %137  ;;  %v250_v49 = vmul.f32 0.0078125, %v1581_v54  ;;  %v450_v54 = vsel %vm410_vm7, %v449_v35, %v445_v51 }
  0xeb   :  { %v243_v13 = vmul.f32 0.0078125, %v1583_v55  ;;  %v581_v1 = vsel %vm375_vm2, %v580_v40, %v576_v26 }
  0xed   :  { %v1587_v60 = vpop.xlane.xlu1 %179  ;;  %v483_v29 = vrot.slane %v243_v13, %v1632_v10 }
  0xee   :  { %v1589_v61 = vpop.xlane.xlu0 %165  ;;  %v264_v55 = vmul.f32 0.0078125, %v1587_v60  ;;  %v411_v60 = vsel %vm410_vm7, %v409_v37, %v404_v14 }
  0xef   :  { %v257_v42 = vmul.f32 0.0078125, %v1589_v61  ;;  %v484_v17 = vsel %vm403_vm6, %v483_v29, %v479_v48 }
  0xf0   :  { %v585_v20 = vrot.slane %v264_v55, %v1601_v7 }
  0xf1   :  { %v1603_v8 = vpop.xlane.xlu1 %205  ;;  %v551_v44 = vrot.slane %v257_v42, %v1608_v12 }
  0xf2   :  { %v1605_v9 = vpop.xlane.xlu0 %193  ;;  %v277_v59 = vmul.f32 0.0078125, %v1603_v8 }
  0xf3   :  { %v271_v18 = vmul.f32 0.0078125, %v1605_v9 }
  0xf5   :  { %v1616_v62 = vpop.xlane.xlu1 %139  ;;  %v619_v45 = vrot.slane %v271_v18, %v1598_v3 }
  0xf6   :  { %v1618_v21 = vpop.xlane.xlu0 %207  ;;  %v244_v38 = vmul.f32 0.0078125, %v1616_v62  ;;  %v546_v62 = vrot.slane %v256_v31, %v1601_v7 }
  0xf7   :  { %v278_v57 = vmul.f32 0.0078125, %v1618_v21  ;;  %v517_v21 = vrot.slane %v250_v49, %v1629_v6  ;;  %v620_v36 = vsel %vm375_vm2, %v619_v45, %v615_v23 }
  0xf8   :  { %v488_v61 = vrot.slane %v244_v38, %v1635_v11  ;;  %v547_v53 = vsel %vm382_vm3, %v546_v62, %v542_v32  ;;  %v586_v32 = vsel %vm382_vm3, %v585_v20, %v581_v1 }
  0xf9   :  { %v1641_v24 = vpop.xlane.xlu1 %167  ;;  %v653_v8 = vrot.slane %v278_v57, %v1595_v0  ;;  %v518_v0 = vsel %vm396_vm5, %v517_v21, %v513_v47 }
  0xfa   :  { %v1643_v15 = vpop.xlane.xlu0 %153  ;;  %v258_v19 = vmul.f32 0.0078125, %v1641_v24  ;;  %v686_v24 = vsel %vm685_vm8, %v450_v54, %v411_v60  ;;  %v489_v34 = vsel %vm410_vm7, %v488_v61, %v484_v17 }
  0xfb   :  { %v251_v22 = vmul.f32 0.0078125, %v1643_v15  ;;  %v649_v15 = vrot.slane %v277_v59, %v1592_v63 }
  0xfc   :  { %v556_v52 = vrot.slane %v258_v19, %v1629_v6 }
  0xfd   :  { %v1661_v4 = vpop.xlane.xlu1 %195  ;;  %v522_v31 = vrot.slane %v251_v22, %v1632_v10  ;;  %v654_v63 = vsel %vm368_vm1, %v653_v8, %v649_v15 }
  0xfe   :  { %v1663_v5 = vpop.xlane.xlu0 %181  ;;  %v272_v30 = vmul.f32 0.0078125, %v1661_v4  ;;  %v552_v4 = vsel %vm389_vm4, %v551_v44, %v547_v53 }
  0xff   :  { %v265_v25 = vmul.f32 0.0078125, %v1663_v5  ;;  %v688_v5 = vsel %vm687_vm9, %v489_v34, %v686_v24  ;;  %v557_v40 = vsel %vm396_vm5, %v556_v52, %v552_v4 }
 0x100   :  { %v624_v13 = vrot.slane %v272_v30, %v1601_v7 }
 0x101   :  { %v1681_v50 = vpop.xlane.xlu1 %155  ;;  %v590_v37 = vrot.slane %v265_v25, %v1608_v12 }
 0x102   :  { %v1683_v41 = vpop.xlane.xlu0 %209  ;;  %v252_v28 = vmul.f32 0.0078125, %v1681_v50  ;;  %v523_v50 = vsel %vm403_vm6, %v522_v31, %v518_v0 }
 0x103   :  { %v279_v14 = vmul.f32 0.0078125, %v1683_v41  ;;  %v591_v29 = vsel %vm389_vm4, %v590_v37, %v586_v32 }
 0x104   :  { %v527_v57 = vrot.slane %v252_v28, %v1635_v11 }
 0x105   :  { %v1701_v2 = vpop.xlane.xlu1 %183 }
 0x106   :  { %v1703_v33 = vpop.xlane.xlu0 %169  ;;  %v266_v35 = vmul.f32 0.0078125, %v1701_v2  ;;  %v528_v20 = vsel %vm410_vm7, %v527_v57, %v523_v50 }
 0x107   :  { %v259_v38 = vmul.f32 0.0078125, %v1703_v33  ;;  %v625_v33 = vsel %vm382_vm3, %v624_v13, %v620_v36 }
 0x108   :  { %v595_v16 = vrot.slane %v266_v35, %v1629_v6 }
 0x109   :  { %v1721_v39 = vpop.xlane.xlu1 %211  ;;  %v561_v54 = vrot.slane %v259_v38, %v1632_v10 }
 0x10a   :  { %v198_v46 = vpop.xlane.xlu0 %197  ;;  %v280_v41 = vmul.f32 0.0078125, %v1721_v39  ;;  %v596_v45 = vsel %vm396_vm5, %v595_v16, %v591_v29  ;;  %v967_v16 = vsub.s32 3, %v1585_v56  ;;  %v1002_v29 = vsub.s32 4, %v1585_v56 }
 0x10b   :  { %v273_v47 = vmul.f32 0.0078125, %v198_v46  ;;  %v658_v46 = vrot.slane %v279_v14, %v1598_v3  ;;  %v562_v23 = vsel %vm403_vm6, %v561_v54, %v557_v40 }
 0x10c   :  { %v663_v19 = vrot.slane %v280_v41, %v1601_v7 }
 0x10d   :  { %v186_v43 = vpop.xlane.xlu1 %185  ;;  %v629_v60 = vrot.slane %v273_v47, %v1608_v12  ;;  %v659_v44 = vsel %vm375_vm2, %v658_v46, %v654_v63  ;;  %vm776_vm2 = vcmask 31744  }
 0x10e   :  { %v172_v9 = vpop.xlane.xlu0 %171  ;;  %v267_v48 = vmul.f32 0.0078125, %v186_v43  ;;  %v664_v0 = vsel %vm382_vm3, %v663_v19, %v659_v44 }
 0x10f   :  { %v260_v42 = vmul.f32 0.0078125, %v172_v9  ;;  %v630_v17 = vsel %vm389_vm4, %v629_v60, %v625_v33  ;;  %v932_v33 = vsub.s32 2, %v1585_v56  ;;  %v1037_v60 = vsub.s32 5, %v1585_v56 }
 0x110   :  { %v600_v59 = vrot.slane %v267_v48, %v1632_v10 }
 0x111   :  { %v214_v26 = vpop.xlane.xlu1 %213  ;;  %v566_v43 = vrot.slane %v260_v42, %v1635_v11 }
 0x112   :  { %v200_v51 = vpop.xlane.xlu0 %199  ;;  %v281_v58 = vmul.f32 0.0078125, %v214_v26  ;;  %v601_v30 = vsel %vm403_vm6, %v600_v59, %v596_v45  ;;  %v1349_v45 = vld [vmem:[#allocation2 + $0x10] sm:$0xff] }
 0x113   :  { %v274_v18 = vmul.f32 0.0078125, %v200_v51  ;;  %v567_v34 = vsel %vm410_vm7, %v566_v43, %v562_v23  ;;  %v1107_v43 = vsub.s32 7, %v1585_v56 }
 0x114   :  { %v668_v8 = vrot.slane %v281_v58, %v1608_v12  ;;  %v690_v12 = vsel %vm689_vm10, %v528_v20, %v688_v5  ;;  %v1347_v20 = vld [vmem:[#allocation2 + $0x8] sm:$0xff] }
 0x115   :  { %v202_v49 = vpop.xlane.xlu1 %201  ;;  %v634_v9 = vrot.slane %v274_v18, %v1629_v6  ;;  %v692_v63 = vsel %vm691_vm11, %v567_v34, %v690_v12  ;;  %v862_v18 = vsub.s32 0, %v1585_v56  ;;  %v1353_v12 = vld [vmem:[#allocation2 + $0x40] sm:$0xff] }
 0x116   :  { %v188_v55 = vpop.xlane.xlu0 %187  ;;  %v275_v2 = vmul.f32 0.0078125, %v202_v49  ;;  %v669_v31 = vsel %vm389_vm4, %v668_v8, %v664_v0 }
 0x117   :  { %v268_v62 = vmul.f32 0.0078125, %v188_v55  ;;  %v635_v25 = vsel %vm396_vm5, %v634_v9, %v630_v17 }
 0x118   :  { %v639_v22 = vrot.slane %v275_v2, %v1632_v10  ;;  %v897_v2 = vsub.s32 1, %v1585_v56 }
 0x119   :  { %v204_v39 = vpop.xlane.xlu1 %203  ;;  %v605_v1 = vrot.slane %v268_v62, %v1635_v11 }
 0x11a   :  { %v216_v61 = vpop.xlane.xlu0 %215  ;;  %v276_v21 = vmul.f32 0.0078125, %v204_v39  ;;  %v640_v32 = vsel %vm403_vm6, %v639_v22, %v635_v25  ;;  %v1072_v39 = vsub.s32 6, %v1585_v56  ;;  %v1348_v22 = vld [vmem:[#allocation2] sm:$0xff] }
 0x11b   :  { %v282_v3 = vmul.f32 0.0078125, %v216_v61  ;;  %v606_v52 = vsel %vm410_vm7, %v605_v1, %v601_v30 }
 0x11c   :  { %v644_v53 = vrot.slane %v276_v21, %v1635_v11  ;;  %v694_v13 = vsel %vm693_vm12, %v606_v52, %v692_v63 }
 0x11d   :  { %v673_v7 = vrot.slane %v282_v3, %v1629_v6  ;;  %v220_v15 = vpop.xlane.xlu1 %219 }
 0x11e   :  { %v218_v24 = vpop.xlane.xlu0 %217  ;;  %v284_v51 = vmul.f32 0.0078125, %v220_v15  ;;  %v645_v6 = vsel %vm410_vm7, %v644_v53, %v640_v32  ;;  %v1350_v53 = vld [vmem:[#allocation2 + $0x20] sm:$0xff] }
 0x11f   :  { %v283_v26 = vmul.f32 0.0078125, %v218_v24  ;;  %v674_v28 = vsel %vm396_vm5, %v673_v7, %v669_v31  ;;  %v696_v35 = vsel %vm695_vm13, %v645_v6, %v694_v13  ;;  %v1351_v7 = vld [vmem:[#allocation2 + $0x18] sm:$0xff]  ;;  %v1854_v31 = vld [vmem:[#allocation8_spill] sm:$0xff] }
 0x120   :  { %v683_v36 = vrot.slane %v284_v51, %v1635_v11  ;;  %v1356_v13 = vld [vmem:[#allocation2 + $0x60] sm:$0xff] }
 0x121   :  { %v678_v4 = vrot.slane %v283_v26, %v1632_v10  ;;  %v775_v10 = vld [vmem:[%s1850_s2] sm:$0xf]  ;;  %v1352_v26 = vld [vmem:[#allocation2 + $0x28] sm:$0xff]  ;;  %s1463_s2 = smov [#allocation5]  }
 0x122   :  { %1320 = vmatpush3.msk.msra.mxu1 %vm780_vm0, %v775_v10  ;;  %v1357_v10 = vld [vmem:[#allocation2 + $0x58] sm:$0xff]  ;;  %s1273_s15 = sshll.u32 %s1463_s2, 4  ;;  %s1274_s15 = int_to_ptr.vmem [resolvable:$true] %s1273_s15 }
 0x123   :  { %v679_v5 = vsel %vm403_vm6, %v678_v4, %v674_v28  ;;  %v1354_v4 = vld [vmem:[#allocation2 + $0x50] sm:$0xff]  ;;  %v1355_v28 = vld [vmem:[#allocation2 + $0x48] sm:$0xff]  ;;  %s1431_s16 = scalar_lea.vmem %s1274_s15, 8192  ;;  %p1436_p9 = scmp.lt.s32.totalorder %s1274_s15, %s1274_s15 }
 0x124   :  { %v684_v14 = vsel %vm410_vm7, %v683_v36, %v679_v5  ;;  %p1432_p8 = scmp.ne.s32.totalorder %s1274_s15, %s1431_s16  ;;  %p1437_p10 = scmp.lt.s32.totalorder %s1431_s16, %s1431_s16 }
 0x125   :  { %v698_v37 = vsel %vm697_vm14, %v684_v14, %v696_v35 }
 0x126   :  { %1317 = vmatmul.mubr.msk.f32.vlgmr.msra.gmra.mrb[0].mxu0 %vm699_vm15, %v698_v37  ;;  %p1438_p11 = por %p1437_p10, %p1436_p9 }
 0x128   :  { %p1439_p12 = pnand %p1438_p11, %p1432_p8 }
 0x1f9   :  { %v768_v11 = vpop.f32.mrb[0].mxu0 }
 0x1fa   :  { %vm772_vm1 = vcmp.gt.f32.partialorder %v768_v11, 0.0  ;;  %v773_v38 = vmul.f32 0.01, %v768_v11  ;;  %v1318_v47 = vpop.f32.mrb[1].mxu0 }
 0x1fc   :  { %v774_v48 = vsel %vm772_vm1, %v768_v11, %v773_v38  ;;  %v1358_v38 = vld [vmem:[#allocation2 + $0x70] sm:$0xff] }
 0x1fd   :  { %1322 = vmatmul.mubr.msk.f32.vlgmr.msra.gmra.mrb[0].mxu1 %vm776_vm2, %v774_v48 }
 0x2d0   :  { %v850_v49 = vpop.f32.mrb[0].mxu1 }
 0x2d1   :  { %v1288_v55 = vmul.f32 -1.442695, %v850_v49  ;;  %v1323_v40 = vpop.f32.mrb[1].mxu1 }
 0x2d3   :  { %1343 = vpow2.f32 %v1288_v55  ;;  %v1359_v55 = vld [vmem:[#allocation2 + $0x68] sm:$0xff] }
 0x2dd   :  { %v1344_v50 = vpop.eup %1343 }
 0x2de   :  { %v857_v42 = vadd.f32 1.0, %v1344_v50  ;;  %v1360_v50 = vld [vmem:[#allocation2 + $0x80] sm:$0xff] }
 0x2e0   :  { %1345 = vrcp.f32 %v857_v42 }
 0x2ea   :  { %v1814_v57 = vpop.eup %1345 }
 0x2eb   :  { %v863_v41 = vrot.slane %v1814_v57, %v862_v18  ;;  %v898_v62 = vrot.slane %v1814_v57, %v897_v2  ;;  %v933_v46 = vrot.slane %v1814_v57, %v932_v33  ;;  %v968_v58 = vrot.slane %v1814_v57, %v967_v16 }
 0x2ec   :  { %v1003_v54 = vrot.slane %v1814_v57, %v1002_v29  ;;  %v1038_v59 = vrot.slane %v1814_v57, %v1037_v60  ;;  %v1073_v61 = vrot.slane %v1814_v57, %v1072_v39  ;;  %v1108_v9 = vrot.slane %v1814_v57, %v1107_v43 }
 0x2ed   :  { %869 = vbcast.lane.b32.xlu1 %v863_v41, 264  ;;  %865 = vbcast.lane.b32.xlu0 %v863_v41, 256 }
 0x2f1   :  { %873 = vbcast.lane.b32.xlu1 %v863_v41, 272  ;;  %881 = vbcast.lane.b32.xlu0 %v863_v41, 288 }
 0x2f5   :  { %877 = vbcast.lane.b32.xlu1 %v863_v41, 280  ;;  %889 = vbcast.lane.b32.xlu0 %v863_v41, 304 }
 0x2f9   :  { %885 = vbcast.lane.b32.xlu1 %v863_v41, 296  ;;  %900 = vbcast.lane.b32.xlu0 %v898_v62, 256 }
 0x2fd   :  { %893 = vbcast.lane.b32.xlu1 %v863_v41, 312  ;;  %908 = vbcast.lane.b32.xlu0 %v898_v62, 272  ;;  %v1361_v41 = vld [vmem:[#allocation2 + $0x78] sm:$0xff] }
 0x301   :  { %904 = vbcast.lane.b32.xlu1 %v898_v62, 264  ;;  %916 = vbcast.lane.b32.xlu0 %v898_v62, 288 }
 0x305   :  { %912 = vbcast.lane.b32.xlu1 %v898_v62, 280  ;;  %924 = vbcast.lane.b32.xlu0 %v898_v62, 304 }
 0x309   :  { %920 = vbcast.lane.b32.xlu1 %v898_v62, 296  ;;  %935 = vbcast.lane.b32.xlu0 %v933_v46, 256 }
 0x30d   :  { %928 = vbcast.lane.b32.xlu1 %v898_v62, 312  ;;  %943 = vbcast.lane.b32.xlu0 %v933_v46, 272  ;;  %v1362_v62 = vld [vmem:[#allocation2 + $0x90] sm:$0xff] }
 0x311   :  { %939 = vbcast.lane.b32.xlu1 %v933_v46, 264  ;;  %951 = vbcast.lane.b32.xlu0 %v933_v46, 288 }
 0x315   :  { %947 = vbcast.lane.b32.xlu1 %v933_v46, 280  ;;  %959 = vbcast.lane.b32.xlu0 %v933_v46, 304 }
 0x319   :  { %955 = vbcast.lane.b32.xlu1 %v933_v46, 296  ;;  %970 = vbcast.lane.b32.xlu0 %v968_v58, 256 }
 0x31d   :  { %963 = vbcast.lane.b32.xlu1 %v933_v46, 312  ;;  %978 = vbcast.lane.b32.xlu0 %v968_v58, 272 }
 0x321   :  { %974 = vbcast.lane.b32.xlu1 %v968_v58, 264  ;;  %986 = vbcast.lane.b32.xlu0 %v968_v58, 288 }
 0x325   :  { %982 = vbcast.lane.b32.xlu1 %v968_v58, 280  ;;  %994 = vbcast.lane.b32.xlu0 %v968_v58, 304 }
 0x329   :  { %990 = vbcast.lane.b32.xlu1 %v968_v58, 296  ;;  %1005 = vbcast.lane.b32.xlu0 %v1003_v54, 256 }
 0x32d   :  { %998 = vbcast.lane.b32.xlu1 %v968_v58, 312  ;;  %1013 = vbcast.lane.b32.xlu0 %v1003_v54, 272  ;;  %v1363_v58 = vld [vmem:[#allocation2 + $0x88] sm:$0xff] }
 0x331   :  { %1009 = vbcast.lane.b32.xlu1 %v1003_v54, 264  ;;  %1021 = vbcast.lane.b32.xlu0 %v1003_v54, 288 }
 0x335   :  { %1017 = vbcast.lane.b32.xlu1 %v1003_v54, 280  ;;  %1029 = vbcast.lane.b32.xlu0 %v1003_v54, 304 }
 0x339   :  { %1025 = vbcast.lane.b32.xlu1 %v1003_v54, 296  ;;  %1040 = vbcast.lane.b32.xlu0 %v1038_v59, 256 }
 0x33d   :  { %1033 = vbcast.lane.b32.xlu1 %v1003_v54, 312  ;;  %1048 = vbcast.lane.b32.xlu0 %v1038_v59, 272  ;;  %v1364_v54 = vld [vmem:[#allocation2 + $0xa0] sm:$0xff] }
 0x341   :  { %1044 = vbcast.lane.b32.xlu1 %v1038_v59, 264  ;;  %1056 = vbcast.lane.b32.xlu0 %v1038_v59, 288 }
 0x345   :  { %1052 = vbcast.lane.b32.xlu1 %v1038_v59, 280  ;;  %1064 = vbcast.lane.b32.xlu0 %v1038_v59, 304 }
 0x349   :  { %1060 = vbcast.lane.b32.xlu1 %v1038_v59, 296  ;;  %1075 = vbcast.lane.b32.xlu0 %v1073_v61, 256 }
 0x34d   :  { %1068 = vbcast.lane.b32.xlu1 %v1038_v59, 312  ;;  %1083 = vbcast.lane.b32.xlu0 %v1073_v61, 272 }
 0x351   :  { %1079 = vbcast.lane.b32.xlu1 %v1073_v61, 264  ;;  %1091 = vbcast.lane.b32.xlu0 %v1073_v61, 288 }
 0x355   :  { %1087 = vbcast.lane.b32.xlu1 %v1073_v61, 280  ;;  %1099 = vbcast.lane.b32.xlu0 %v1073_v61, 304 }
 0x359   :  { %1095 = vbcast.lane.b32.xlu1 %v1073_v61, 296  ;;  %1110 = vbcast.lane.b32.xlu0 %v1108_v9, 256 }
 0x35d   :  { %1103 = vbcast.lane.b32.xlu1 %v1073_v61, 312  ;;  %1118 = vbcast.lane.b32.xlu0 %v1108_v9, 272  ;;  %v1365_v61 = vld [vmem:[#allocation2 + $0x98] sm:$0xff] }
 0x35f   :  { %v870_v21 = vpop.permute.xlu1 %869  ;;  %v866_v3 = vpop.permute.xlu0 %865 }
 0x360   :  { %v1141_v19 = vmul.f32 %v1347_v20, %v870_v21  ;;  %v1140_v1 = vmul.f32 %v1348_v22, %v866_v3 }
 0x361   :  { %1114 = vbcast.lane.b32.xlu1 %v1108_v9, 264  ;;  %1126 = vbcast.lane.b32.xlu0 %v1108_v9, 288 }
 0x362   :  { %1205 = vst [vmem:[#allocation5 + $0x8] sm:$0xff] %v1141_v19  ;;  %1204 = vst [vmem:[#allocation5] sm:$0xff] %v1140_v1  ;;  %v1367_v19 = vld [vmem:[#allocation2 + $0xa8] sm:$0xff]  ;;  %v1368_v1 = vld [vmem:[#allocation2 + $0xc0] sm:$0xff] }
 0x363   :  { %v874_v44 = vpop.permute.xlu1 %873  ;;  %v882_v56 = vpop.permute.xlu0 %881 }
 0x364   :  { %v1142_v8 = vmul.f32 %v1349_v45, %v874_v44  ;;  %v1144_v23 = vmul.f32 %v1350_v53, %v882_v56 }
 0x365   :  { %1122 = vbcast.lane.b32.xlu1 %v1108_v9, 280  ;;  %1134 = vbcast.lane.b32.xlu0 %v1108_v9, 304 }
 0x366   :  { %1206 = vst [vmem:[#allocation5 + $0x10] sm:$0xff] %v1142_v8  ;;  %1208 = vst [vmem:[#allocation5 + $0x20] sm:$0xff] %v1144_v23  ;;  %v1369_v8 = vld [vmem:[#allocation2 + $0xb8] sm:$0xff]  ;;  %v1370_v23 = vld [vmem:[#allocation2 + $0xd0] sm:$0xff] }
 0x367   :  { %v878_v17 = vpop.permute.xlu1 %877  ;;  %v890_v30 = vpop.permute.xlu0 %889 }
 0x368   :  { %v1143_v24 = vmul.f32 %v1351_v7, %v878_v17  ;;  %v1146_v15 = vmul.f32 %v890_v30, %v1499_v27 }
 0x369   :  { %1130 = vbcast.lane.b32.xlu1 %v1108_v9, 296 }
 0x36a   :  { %1207 = vst [vmem:[#allocation5 + $0x18] sm:$0xff] %v1143_v24  ;;  %1210 = vst [vmem:[#allocation5 + $0x30] sm:$0xff] %v1146_v15  ;;  %v1371_v24 = vld [vmem:[#allocation2 + $0xc8] sm:$0xff] }
 0x36b   :  { %v886_v34 = vpop.permute.xlu1 %885  ;;  %v901_v25 = vpop.permute.xlu0 %900 }
 0x36c   :  { %v1145_v51 = vmul.f32 %v1352_v26, %v886_v34  ;;  %v1148_v0 = vmul.f32 %v1353_v12, %v901_v25  ;;  %v1372_v34 = vld [vmem:[#allocation2 + $0xe0] sm:$0xff]  ;;  %v1373_v12 = vld [vmem:[#allocation2 + $0xd8] sm:$0xff] }
 0x36d   :  { %1138 = vbcast.lane.b32.xlu1 %v1108_v9, 312  ;;  %v1366_v9 = vld [vmem:[#allocation2 + $0xb0] sm:$0xff] }
 0x36e   :  { %1209 = vst [vmem:[#allocation5 + $0x28] sm:$0xff] %v1145_v51  ;;  %1212 = vst [vmem:[#allocation5 + $0x40] sm:$0xff] %v1148_v0 }
 0x36f   :  { %v894_v32 = vpop.permute.xlu1 %893  ;;  %v909_v52 = vpop.permute.xlu0 %908 }
 0x370   :  { %v1147_v6 = vmul.f32 %v894_v32, %v1854_v31  ;;  %v1150_v36 = vmul.f32 %v1354_v4, %v909_v52  ;;  %v1374_v32 = vld [vmem:[#allocation2 + $0xf0] sm:$0xff]  ;;  %v1375_v4 = vld [vmem:[#allocation2 + $0xe8] sm:$0xff] }
 0x372   :  { %1211 = vst [vmem:[#allocation5 + $0x38] sm:$0xff] %v1147_v6  ;;  %1214 = vst [vmem:[#allocation5 + $0x50] sm:$0xff] %v1150_v36 }
 0x373   :  { %v905_v27 = vpop.permute.xlu1 %904  ;;  %v917_v63 = vpop.permute.xlu0 %916 }
 0x374   :  { %v1149_v5 = vmul.f32 %v1355_v28, %v905_v27  ;;  %v1152_v14 = vmul.f32 %v1356_v13, %v917_v63  ;;  %v1376_v27 = vld [vmem:[#allocation2 + $0x100] sm:$0xff]  ;;  %v1377_v13 = vld [vmem:[#allocation2 + $0xf8] sm:$0xff] }
 0x376   :  { %1213 = vst [vmem:[#allocation5 + $0x48] sm:$0xff] %v1149_v5  ;;  %1216 = vst [vmem:[#allocation5 + $0x60] sm:$0xff] %v1152_v14 }
 0x377   :  { %v913_v35 = vpop.permute.xlu1 %912  ;;  %v925_v37 = vpop.permute.xlu0 %924 }
 0x378   :  { %v1151_v11 = vmul.f32 %v1357_v10, %v913_v35  ;;  %v1154_v47 = vmul.f32 %v1358_v38, %v925_v37  ;;  %v1378_v35 = vld [vmem:[#allocation2 + $0x110] sm:$0xff]  ;;  %v1379_v38 = vld [vmem:[#allocation2 + $0x108] sm:$0xff] }
 0x37a   :  { %1215 = vst [vmem:[#allocation5 + $0x58] sm:$0xff] %v1151_v11  ;;  %1218 = vst [vmem:[#allocation5 + $0x70] sm:$0xff] %v1154_v47 }
 0x37b   :  { %v921_v48 = vpop.permute.xlu1 %920  ;;  %v936_v49 = vpop.permute.xlu0 %935 }
 0x37c   :  { %v1153_v40 = vmul.f32 %v1359_v55, %v921_v48  ;;  %v1156_v42 = vmul.f32 %v1360_v50, %v936_v49  ;;  %v1380_v48 = vld [vmem:[#allocation2 + $0x120] sm:$0xff]  ;;  %v1381_v50 = vld [vmem:[#allocation2 + $0x118] sm:$0xff] }
 0x37e   :  { %1217 = vst [vmem:[#allocation5 + $0x68] sm:$0xff] %v1153_v40  ;;  %1220 = vst [vmem:[#allocation5 + $0x80] sm:$0xff] %v1156_v42 }
 0x37f   :  { %v929_v18 = vpop.permute.xlu1 %928  ;;  %v944_v57 = vpop.permute.xlu0 %943 }
 0x380   :  { %v1155_v2 = vmul.f32 %v1361_v41, %v929_v18  ;;  %v1158_v33 = vmul.f32 %v1362_v62, %v944_v57  ;;  %v1382_v18 = vld [vmem:[#allocation2 + $0x130] sm:$0xff]  ;;  %v1383_v62 = vld [vmem:[#allocation2 + $0x128] sm:$0xff] }
 0x382   :  { %1219 = vst [vmem:[#allocation5 + $0x78] sm:$0xff] %v1155_v2  ;;  %1222 = vst [vmem:[#allocation5 + $0x90] sm:$0xff] %v1158_v33 }
 0x383   :  { %v940_v46 = vpop.permute.xlu1 %939  ;;  %v952_v16 = vpop.permute.xlu0 %951 }
 0x384   :  { %v1157_v29 = vmul.f32 %v1363_v58, %v940_v46  ;;  %v1160_v60 = vmul.f32 %v1364_v54, %v952_v16  ;;  %v1384_v46 = vld [vmem:[#allocation2 + $0x140] sm:$0xff]  ;;  %v1385_v54 = vld [vmem:[#allocation2 + $0x138] sm:$0xff] }
 0x386   :  { %1221 = vst [vmem:[#allocation5 + $0x88] sm:$0xff] %v1157_v29  ;;  %1224 = vst [vmem:[#allocation5 + $0xa0] sm:$0xff] %v1160_v60 }
 0x387   :  { %v948_v59 = vpop.permute.xlu1 %947  ;;  %v960_v39 = vpop.permute.xlu0 %959 }
 0x388   :  { %v1159_v43 = vmul.f32 %v1365_v61, %v948_v59  ;;  %v1162_v21 = vmul.f32 %v1366_v9, %v960_v39  ;;  %v1386_v59 = vld [vmem:[#allocation2 + $0x150] sm:$0xff]  ;;  %v1387_v9 = vld [vmem:[#allocation2 + $0x148] sm:$0xff] }
 0x38a   :  { %1223 = vst [vmem:[#allocation5 + $0x98] sm:$0xff] %v1159_v43  ;;  %1226 = vst [vmem:[#allocation5 + $0xb0] sm:$0xff] %v1162_v21 }
 0x38b   :  { %v956_v3 = vpop.permute.xlu1 %955  ;;  %v971_v20 = vpop.permute.xlu0 %970 }
 0x38c   :  { %v1161_v22 = vmul.f32 %v1367_v19, %v956_v3  ;;  %v1164_v44 = vmul.f32 %v1368_v1, %v971_v20  ;;  %v1388_v3 = vld [vmem:[#allocation2 + $0x160] sm:$0xff]  ;;  %v1389_v1 = vld [vmem:[#allocation2 + $0x158] sm:$0xff] }
 0x38e   :  { %1225 = vst [vmem:[#allocation5 + $0xa8] sm:$0xff] %v1161_v22  ;;  %1228 = vst [vmem:[#allocation5 + $0xc0] sm:$0xff] %v1164_v44 }
 0x38f   :  { %v964_v56 = vpop.permute.xlu1 %963  ;;  %v979_v45 = vpop.permute.xlu0 %978 }
 0x390   :  { %v1163_v53 = vmul.f32 %v1369_v8, %v964_v56  ;;  %v1166_v17 = vmul.f32 %v1370_v23, %v979_v45  ;;  %v1390_v56 = vld [vmem:[#allocation2 + $0x170] sm:$0xff]  ;;  %v1391_v23 = vld [vmem:[#allocation2 + $0x168] sm:$0xff] }
 0x392   :  { %1227 = vst [vmem:[#allocation5 + $0xb8] sm:$0xff] %v1163_v53  ;;  %1230 = vst [vmem:[#allocation5 + $0xd0] sm:$0xff] %v1166_v17 }
 0x393   :  { %v975_v30 = vpop.permute.xlu1 %974  ;;  %v987_v7 = vpop.permute.xlu0 %986 }
 0x394   :  { %v1165_v15 = vmul.f32 %v1371_v24, %v975_v30  ;;  %v1168_v25 = vmul.f32 %v1372_v34, %v987_v7  ;;  %v1392_v30 = vld [vmem:[#allocation2 + $0x180] sm:$0xff]  ;;  %v1393_v34 = vld [vmem:[#allocation2 + $0x178] sm:$0xff] }
 0x396   :  { %1229 = vst [vmem:[#allocation5 + $0xc8] sm:$0xff] %v1165_v15  ;;  %1232 = vst [vmem:[#allocation5 + $0xe0] sm:$0xff] %v1168_v25 }
 0x397   :  { %v983_v26 = vpop.permute.xlu1 %982  ;;  %v995_v51 = vpop.permute.xlu0 %994 }
 0x398   :  { %v1167_v0 = vmul.f32 %v1373_v12, %v983_v26  ;;  %v1170_v52 = vmul.f32 %v1374_v32, %v995_v51  ;;  %v1394_v26 = vld [vmem:[#allocation2 + $0x190] sm:$0xff]  ;;  %v1395_v32 = vld [vmem:[#allocation2 + $0x188] sm:$0xff] }
 0x39a   :  { %1231 = vst [vmem:[#allocation5 + $0xd8] sm:$0xff] %v1167_v0  ;;  %1234 = vst [vmem:[#allocation5 + $0xf0] sm:$0xff] %v1170_v52 }
 0x39b   :  { %v991_v31 = vpop.permute.xlu1 %990  ;;  %v1006_v6 = vpop.permute.xlu0 %1005 }
 0x39c   :  { %v1169_v36 = vmul.f32 %v1375_v4, %v991_v31  ;;  %v1172_v63 = vmul.f32 %v1376_v27, %v1006_v6  ;;  %v1396_v31 = vld [vmem:[#allocation2 + $0x1a0] sm:$0xff]  ;;  %v1397_v27 = vld [vmem:[#allocation2 + $0x198] sm:$0xff] }
 0x39e   :  { %1233 = vst [vmem:[#allocation5 + $0xe8] sm:$0xff] %v1169_v36  ;;  %1236 = vst [vmem:[#allocation5 + $0x100] sm:$0xff] %v1172_v63 }
 0x39f   :  { %v999_v28 = vpop.permute.xlu1 %998  ;;  %v1014_v5 = vpop.permute.xlu0 %1013 }
 0x3a0   :  { %v1171_v14 = vmul.f32 %v1377_v13, %v999_v28  ;;  %v1174_v37 = vmul.f32 %v1378_v35, %v1014_v5  ;;  %v1398_v28 = vld [vmem:[#allocation2 + $0x1b0] sm:$0xff]  ;;  %v1399_v35 = vld [vmem:[#allocation2 + $0x1a8] sm:$0xff] }
 0x3a2   :  { %1235 = vst [vmem:[#allocation5 + $0xf8] sm:$0xff] %v1171_v14  ;;  %1238 = vst [vmem:[#allocation5 + $0x110] sm:$0xff] %v1174_v37 }
 0x3a3   :  { %v1010_v10 = vpop.permute.xlu1 %1009  ;;  %v1022_v11 = vpop.permute.xlu0 %1021 }
 0x3a4   :  { %v1173_v47 = vmul.f32 %v1379_v38, %v1010_v10  ;;  %v1176_v49 = vmul.f32 %v1380_v48, %v1022_v11  ;;  %v1400_v10 = vld [vmem:[#allocation2 + $0x1c0] sm:$0xff]  ;;  %v1401_v48 = vld [vmem:[#allocation2 + $0x1b8] sm:$0xff] }
 0x3a6   :  { %1237 = vst [vmem:[#allocation5 + $0x108] sm:$0xff] %v1173_v47  ;;  %1240 = vst [vmem:[#allocation5 + $0x120] sm:$0xff] %v1176_v49 }
 0x3a7   :  { %v1018_v55 = vpop.permute.xlu1 %1017  ;;  %v1030_v40 = vpop.permute.xlu0 %1029 }
 0x3a8   :  { %v1175_v42 = vmul.f32 %v1381_v50, %v1018_v55  ;;  %v1178_v57 = vmul.f32 %v1382_v18, %v1030_v40  ;;  %v1402_v55 = vld [vmem:[#allocation2 + $0x1d0] sm:$0xff]  ;;  %v1403_v18 = vld [vmem:[#allocation2 + $0x1c8] sm:$0xff] }
 0x3aa   :  { %1239 = vst [vmem:[#allocation5 + $0x118] sm:$0xff] %v1175_v42  ;;  %1242 = vst [vmem:[#allocation5 + $0x130] sm:$0xff] %v1178_v57 }
 0x3ab   :  { %v1026_v41 = vpop.permute.xlu1 %1025  ;;  %v1041_v2 = vpop.permute.xlu0 %1040 }
 0x3ac   :  { %v1177_v33 = vmul.f32 %v1383_v62, %v1026_v41  ;;  %v1180_v16 = vmul.f32 %v1384_v46, %v1041_v2  ;;  %v1404_v41 = vld [vmem:[#allocation2 + $0x1e0] sm:$0xff]  ;;  %v1405_v46 = vld [vmem:[#allocation2 + $0x1d8] sm:$0xff] }
 0x3ae   :  { %1241 = vst [vmem:[#allocation5 + $0x128] sm:$0xff] %v1177_v33  ;;  %1244 = vst [vmem:[#allocation5 + $0x140] sm:$0xff] %v1180_v16 }
 0x3af   :  { %v1034_v58 = vpop.permute.xlu1 %1033  ;;  %v1049_v29 = vpop.permute.xlu0 %1048 }
 0x3b0   :  { %v1179_v60 = vmul.f32 %v1385_v54, %v1034_v58  ;;  %v1182_v39 = vmul.f32 %v1386_v59, %v1049_v29  ;;  %v1406_v58 = vld [vmem:[#allocation2 + $0x1f0] sm:$0xff] }
 0x3b2   :  { %1243 = vst [vmem:[#allocation5 + $0x138] sm:$0xff] %v1179_v60  ;;  %1246 = vst [vmem:[#allocation5 + $0x150] sm:$0xff] %v1182_v39  ;;  %v1407_v60 = vld [vmem:[#allocation2 + $0x1e8] sm:$0xff] }
 0x3b3   :  { %v1045_v61 = vpop.permute.xlu1 %1044  ;;  %v1057_v43 = vpop.permute.xlu0 %1056 }
 0x3b4   :  { %v1181_v21 = vmul.f32 %v1387_v9, %v1045_v61  ;;  %v1184_v20 = vmul.f32 %v1388_v3, %v1057_v43  ;;  %v1408_v61 = vld [vmem:[#allocation2 + $0x1f8] sm:$0xff] }
 0x3b6   :  { %1245 = vst [vmem:[#allocation5 + $0x148] sm:$0xff] %v1181_v21  ;;  %1248 = vst [vmem:[#allocation5 + $0x160] sm:$0xff] %v1184_v20 }
 0x3b7   :  { %v1053_v19 = vpop.permute.xlu1 %1052  ;;  %v1065_v22 = vpop.permute.xlu0 %1064 }
 0x3b8   :  { %v1183_v44 = vmul.f32 %v1389_v1, %v1053_v19  ;;  %v1186_v45 = vmul.f32 %v1390_v56, %v1065_v22 }
 0x3ba   :  { %1247 = vst [vmem:[#allocation5 + $0x158] sm:$0xff] %v1183_v44  ;;  %1250 = vst [vmem:[#allocation5 + $0x170] sm:$0xff] %v1186_v45 }
 0x3bb   :  { %v1061_v8 = vpop.permute.xlu1 %1060  ;;  %v1076_v53 = vpop.permute.xlu0 %1075 }
 0x3bc   :  { %v1185_v17 = vmul.f32 %v1391_v23, %v1061_v8  ;;  %v1188_v7 = vmul.f32 %v1392_v30, %v1076_v53 }
 0x3be   :  { %1249 = vst [vmem:[#allocation5 + $0x168] sm:$0xff] %v1185_v17  ;;  %1252 = vst [vmem:[#allocation5 + $0x180] sm:$0xff] %v1188_v7 }
 0x3bf   :  { %v1069_v24 = vpop.permute.xlu1 %1068  ;;  %v1084_v15 = vpop.permute.xlu0 %1083 }
 0x3c0   :  { %v1187_v25 = vmul.f32 %v1393_v34, %v1069_v24  ;;  %v1190_v51 = vmul.f32 %v1394_v26, %v1084_v15 }
 0x3c2   :  { %1251 = vst [vmem:[#allocation5 + $0x178] sm:$0xff] %v1187_v25  ;;  %1254 = vst [vmem:[#allocation5 + $0x190] sm:$0xff] %v1190_v51 }
 0x3c3   :  { %v1080_v12 = vpop.permute.xlu1 %1079  ;;  %v1092_v0 = vpop.permute.xlu0 %1091 }
 0x3c4   :  { %v1189_v52 = vmul.f32 %v1395_v32, %v1080_v12  ;;  %v1192_v6 = vmul.f32 %v1396_v31, %v1092_v0 }
 0x3c6   :  { %1253 = vst [vmem:[#allocation5 + $0x188] sm:$0xff] %v1189_v52  ;;  %1256 = vst [vmem:[#allocation5 + $0x1a0] sm:$0xff] %v1192_v6 }
 0x3c7   :  { %v1088_v4 = vpop.permute.xlu1 %1087  ;;  %v1100_v36 = vpop.permute.xlu0 %1099 }
 0x3c8   :  { %v1191_v63 = vmul.f32 %v1397_v27, %v1088_v4  ;;  %v1194_v5 = vmul.f32 %v1398_v28, %v1100_v36 }
 0x3ca   :  { %1255 = vst [vmem:[#allocation5 + $0x198] sm:$0xff] %v1191_v63  ;;  %1258 = vst [vmem:[#allocation5 + $0x1b0] sm:$0xff] %v1194_v5 }
 0x3cb   :  { %v1096_v13 = vpop.permute.xlu1 %1095  ;;  %v1111_v14 = vpop.permute.xlu0 %1110 }
 0x3cc   :  { %v1193_v37 = vmul.f32 %v1399_v35, %v1096_v13  ;;  %v1196_v11 = vmul.f32 %v1400_v10, %v1111_v14 }
 0x3ce   :  { %1257 = vst [vmem:[#allocation5 + $0x1a8] sm:$0xff] %v1193_v37  ;;  %1260 = vst [vmem:[#allocation5 + $0x1c0] sm:$0xff] %v1196_v11 }
 0x3cf   :  { %v1104_v38 = vpop.permute.xlu1 %1103  ;;  %v1119_v47 = vpop.permute.xlu0 %1118 }
 0x3d0   :  { %v1195_v49 = vmul.f32 %v1401_v48, %v1104_v38  ;;  %v1198_v40 = vmul.f32 %v1402_v55, %v1119_v47 }
 0x3d2   :  { %1259 = vst [vmem:[#allocation5 + $0x1b8] sm:$0xff] %v1195_v49  ;;  %1262 = vst [vmem:[#allocation5 + $0x1d0] sm:$0xff] %v1198_v40 }
 0x3d3   :  { %v1115_v50 = vpop.permute.xlu1 %1114  ;;  %v1127_v42 = vpop.permute.xlu0 %1126 }
 0x3d4   :  { %v1197_v57 = vmul.f32 %v1403_v18, %v1115_v50  ;;  %v1200_v2 = vmul.f32 %v1404_v41, %v1127_v42 }
 0x3d6   :  { %1261 = vst [vmem:[#allocation5 + $0x1c8] sm:$0xff] %v1197_v57  ;;  %1264 = vst [vmem:[#allocation5 + $0x1e0] sm:$0xff] %v1200_v2 }
 0x3d7   :  { %v1123_v62 = vpop.permute.xlu1 %1122  ;;  %v1135_v33 = vpop.permute.xlu0 %1134 }
 0x3d8   :  { %v1199_v16 = vmul.f32 %v1405_v46, %v1123_v62  ;;  %v1202_v29 = vmul.f32 %v1406_v58, %v1135_v33 }
 0x3da   :  { %1263 = vst [vmem:[#allocation5 + $0x1d8] sm:$0xff] %v1199_v16  ;;  %1266 = vst [vmem:[#allocation5 + $0x1f0] sm:$0xff] %v1202_v29 }
 0x3db   :  { %v1131_v54 = vpop.permute.xlu1 %1130 }
 0x3dc   :  { %v1201_v59 = vmul.f32 %v1407_v60, %v1131_v54 }
 0x3de   :  { %1265 = vst [vmem:[#allocation5 + $0x1e8] sm:$0xff] %v1201_v59 }
 0x3df   :  { %v1139_v39 = vpop.permute.xlu1 %1138 }
 0x3e0   :  { %v1203_v43 = vmul.f32 %v1408_v61, %v1139_v39 }
 0x3e2   :  { %1267 = vst [vmem:[#allocation5 + $0x1f8] sm:$0xff] %v1203_v43 }
 0x3e3   :  { %1442 = shalt.err (!%p1439_p12)
}
 0x3e4   :  { %s1443_s19 = scalar_lea.hbm %s1851_s3, 8192 }
 0x3e5   :  { %p1444_p13 = scmp.ne.s32.totalorder %s1851_s3, %s1443_s19  ;;  %p1447_p0 = scmp.lt.u32.totalorder %s1443_s19, %s1851_s3 }
 0x3e7   :  { %p1449_p1 = pnand %p1447_p0, %p1444_p13 }
 0x3e9   :  { %1452 = shalt.err (!%p1449_p1)
}
 0x3ea   :  { %1279 = dma.vmem_to_hbm [thread:$0]  %s1274_s15, 8192, %s1851_s3, [#allocation4], %s1458_s22, %s1458_s22, %s1459_s23  }
 0x3eb   :  { %1455 = dma.done.wait [#allocation4], 8192  }
 0x3ec   :  { %1456 = vsyncadd [#allocation4], 4294959104 }
 0x3ed   :  { %1283 = vsyncpa [#allocation3], 1 }
 0x3ee   :  { %1284 = vsyncpa [#allocation4], 1 }

</bundles_post_ra>
